<compile_context>
chip_gen: v7x
topology: tpu7x:2x2x1
jax: 0.10.0
libtpu: 0.0.40
codegen_flags: <defaults>
</compile_context>

<pallas_src>
import jax
import jax.numpy as jnp
from jax import lax
from jax.experimental import pallas as pl
from jax.experimental.pallas import tpu as pltpu


def _infonce_kernel(params_ref, fg_img_ref, bg_img_ref, fg_txt_ref, bg_txt_ref,
                    loss_ref):
    # SMEM scalars: folded into the existing row scales at zero runtime cost.
    inv_t = params_ref[0]      # 1 / temperature
    w_fg = params_ref[1]       # alpha
    w_bg = params_ref[2]       # beta / K if bg_bg_pos else 0.0

    fg_img = fg_img_ref[...]   # (B, D)
    bg_img = bg_img_ref[...]   # (B, D)
    fg_txt = fg_txt_ref[...]   # (B, D)
    bg_txt = bg_txt_ref[...]   # (B, K, D)

    # Deferred L2 normalization: per-row inverse norms (lane reduce + rsqrt),
    # applied to the logits instead of normalizing the feature tensors.
    def inv_norm_rows(x):
        return lax.rsqrt(jnp.maximum(jnp.sum(x * x, axis=-1, keepdims=True),
                                     1e-30))

    inv_fi = inv_norm_rows(fg_img)                                    # (B, 1)
    inv_bi = inv_norm_rows(bg_img)                                    # (B, 1)
    inv_ft = inv_norm_rows(fg_txt)                                    # (B, 1)
    inv_bt = lax.rsqrt(
        jnp.maximum(jnp.sum(bg_txt * bg_txt, axis=-1), 1e-30))        # (B, K)

    # Only the consumed similarities — no dense 2B x B(1+K) matrix.
    fg_fg = jnp.sum(fg_img * fg_txt, axis=-1, keepdims=True)          # (B, 1)
    bg_fg = jnp.sum(bg_img * fg_txt, axis=-1, keepdims=True)          # (B, 1)
    fg_bg = jnp.sum(fg_img[:, None, :] * bg_txt, axis=-1)             # (B, K)
    bg_bg = jnp.sum(bg_img[:, None, :] * bg_txt, axis=-1)             # (B, K)

    # Logits: temperature folded into the image-side scale.
    fg_fg_l = fg_fg * (inv_fi * inv_t) * inv_ft                       # (B, 1)
    bg_fg_l = bg_fg * (inv_bi * inv_t) * inv_ft                       # (B, 1)
    fg_bg_l = fg_bg * (inv_fi * inv_t) * inv_bt                       # (B, K)
    bg_bg_l = bg_bg * (inv_bi * inv_t) * inv_bt                       # (B, K)

    # Per-class max stabilization (cancels exactly in log(neg) - log(pos)).
    use_bg = w_bg > 0.0
    m_pos = jnp.maximum(
        jnp.max(fg_fg_l, keepdims=True),
        jnp.where(use_bg, jnp.max(bg_bg_l, keepdims=True), -jnp.inf))  # (1, 1)
    m_neg = jnp.maximum(jnp.max(bg_fg_l, keepdims=True),
                        jnp.max(fg_bg_l, keepdims=True))               # (1, 1)

    # exp(-inf) = 0 keeps the disabled bg/bg positives out without inf*0 NaNs.
    bg_bg_shift = jnp.where(use_bg, bg_bg_l - m_pos, -jnp.inf)
    positive = (w_fg * jnp.sum(jnp.exp(fg_fg_l - m_pos), keepdims=True)
                + w_bg * jnp.sum(jnp.exp(bg_bg_shift), keepdims=True))  # (1, 1)
    negative = (jnp.sum(jnp.exp(bg_fg_l - m_neg), keepdims=True)
                + jnp.sum(jnp.exp(fg_bg_l - m_neg), keepdims=True))     # (1, 1)

    # loss = -log(pos / neg) = log(neg) - log(pos); the maxes re-enter and
    # cancel the shifts exactly.
    loss = (jnp.log(negative) + m_neg) - (jnp.log(positive) + m_pos)   # (1, 1)
    loss_ref[0, 0] = loss[0, 0]


def infonce_loss_pallas(fg_img_feats, bg_img_feats, fg_txt_feats, bg_txt_feats,
                        temperature=1.0, bg_bg_pos=False, alpha=1.0, beta=1.0):
    B, D = fg_img_feats.shape
    K = bg_txt_feats.shape[1]
    assert bg_txt_feats.shape == (B, K, D)

    # Scalars go to SMEM (traced, not baked into the kernel): one compile
    # serves every (temperature, bg_bg_pos, alpha, beta) combination.
    inv_t = 1.0 / jnp.asarray(temperature, jnp.float32)
    w_fg = jnp.asarray(alpha, jnp.float32)
    w_bg = (jnp.asarray(beta, jnp.float32) / float(K)) * \
        jnp.asarray(bg_bg_pos, jnp.float32)
    params = jnp.stack([inv_t, w_fg, w_bg])

    out = pl.pallas_call(
        _infonce_kernel,
        out_shape=jax.ShapeDtypeStruct((1, 1), jnp.float32),
        in_specs=[
            pl.BlockSpec(memory_space=pltpu.MemorySpace.SMEM),   # params (3,)
            pl.BlockSpec(memory_space=pltpu.MemorySpace.VMEM),   # fg_img (B, D)
            pl.BlockSpec(memory_space=pltpu.MemorySpace.VMEM),   # bg_img (B, D)
            pl.BlockSpec(memory_space=pltpu.MemorySpace.VMEM),   # fg_txt (B, D)
            pl.BlockSpec(memory_space=pltpu.MemorySpace.VMEM),   # bg_txt (B, K, D)
        ],
        out_specs=pl.BlockSpec(memory_space=pltpu.MemorySpace.SMEM),
    )(params,
      fg_img_feats.astype(jnp.float32),
      bg_img_feats.astype(jnp.float32),
      fg_txt_feats.astype(jnp.float32),
      bg_txt_feats.astype(jnp.float32))
    return out[0, 0]


def infonce_loss_ref(fg_img, bg_img, fg_txt, bg_txt,
                     temperature=1.0, bg_bg_pos=False, alpha=1.0, beta=1.0):
    """Plain-JAX reference mirroring the PyTorch loop semantics (fixed K)."""
    def l2norm(x):
        return x / jnp.linalg.norm(x, axis=-1, keepdims=True)
    fg_img_n, bg_img_n = l2norm(fg_img), l2norm(bg_img)
    fg_txt_n, bg_txt_n = l2norm(fg_txt), l2norm(bg_txt)
    inv_t = 1.0 / temperature
    fg_fg = jnp.sum(fg_img_n * fg_txt_n, axis=-1)
    bg_fg = jnp.sum(bg_img_n * fg_txt_n, axis=-1)
    fg_bg = jnp.sum(fg_img_n[:, None, :] * bg_txt_n, axis=-1)
    pos = alpha * jnp.sum(jnp.exp(fg_fg * inv_t))
    neg = jnp.sum(jnp.exp(bg_fg * inv_t)) + jnp.sum(jnp.exp(fg_bg * inv_t))
    if bg_bg_pos:
        bg_bg = jnp.sum(bg_img_n[:, None, :] * bg_txt_n, axis=-1)
        pos = pos + beta * jnp.sum(jnp.mean(jnp.exp(bg_bg * inv_t), axis=-1))
    return -jnp.log(pos / neg)


if __name__ == "__main__":
    # TODO(synk): CLIP encode_image / encode_text / clip.tokenize and the
    # Python-list fg-label removal from bg_label are external-model logic with
    # no Pallas equivalent; features are synthesized deterministically.
    B, K, D = 8, 8, 128   # batch, bg-texts per sample, CLIP feature dim (small)

    key = jax.random.PRNGKey(0)
    k1, k2, k3, k4 = jax.random.split(key, 4)
    fg_img_feats = jax.random.normal(k1, (B, D), dtype=jnp.float32)
    bg_img_feats = jax.random.normal(k2, (B, D), dtype=jnp.float32)
    fg_txt_feats = jax.random.normal(k3, (B, D), dtype=jnp.float32)
    bg_txt_feats = jax.random.normal(k4, (B, K, D), dtype=jnp.float32)

    # One jit / one kernel compile serves every (temperature, bg_bg_pos) combo:
    # all hyperparameters are traced scalars that land in SMEM.
    loss_fn = jax.jit(infonce_loss_pallas)

    for (temp, use_bg_bg) in [(1.0, True), (0.07, False)]:
        loss = loss_fn(fg_img_feats, bg_img_feats, fg_txt_feats, bg_txt_feats,
                       temperature=temp, bg_bg_pos=use_bg_bg,
                       alpha=1.0, beta=1.0)
        loss = jax.block_until_ready(loss)
        ref = infonce_loss_ref(fg_img_feats, bg_img_feats, fg_txt_feats,
                               bg_txt_feats, temperature=temp,
                               bg_bg_pos=use_bg_bg, alpha=1.0, beta=1.0)
        assert jnp.allclose(loss, ref, rtol=1e-4, atol=1e-4), \
            (temp, use_bg_bg, loss, ref)

    print("KERNEL_OK")
</pallas_src>

<mosaic_0001>
module attributes {stable_mosaic.version = 11 : i64} {
  func.func @_infonce_kernel(%arg0: memref<3xf32, #tpu.memory_space<smem>>, %arg1: memref<8x128xf32, #tpu.memory_space<vmem>>, %arg2: memref<8x128xf32, #tpu.memory_space<vmem>>, %arg3: memref<8x128xf32, #tpu.memory_space<vmem>>, %arg4: memref<8x8x128xf32, #tpu.memory_space<vmem>>, %arg5: memref<1x1xf32, #tpu.memory_space<smem>>) attributes {dimension_semantics = [], scalar_prefetch = 0 : i64, scratch_operands = 0 : i64, tpu.core_type = #tpu.core_type<tc>} {
    %c0 = arith.constant 0 : index
    %0 = memref.load %arg0[%c0] : memref<3xf32, #tpu.memory_space<smem>>
    %c1 = arith.constant 1 : index
    %1 = memref.load %arg0[%c1] : memref<3xf32, #tpu.memory_space<smem>>
    %c2 = arith.constant 2 : index
    %2 = memref.load %arg0[%c2] : memref<3xf32, #tpu.memory_space<smem>>
    %c0_0 = arith.constant 0 : index
    %c0_1 = arith.constant 0 : index
    %3 = vector.load %arg1[%c0_0, %c0_1] : memref<8x128xf32, #tpu.memory_space<vmem>>, vector<8x128xf32>
    %c0_2 = arith.constant 0 : index
    %c0_3 = arith.constant 0 : index
    %4 = vector.load %arg2[%c0_2, %c0_3] : memref<8x128xf32, #tpu.memory_space<vmem>>, vector<8x128xf32>
    %c0_4 = arith.constant 0 : index
    %c0_5 = arith.constant 0 : index
    %5 = vector.load %arg3[%c0_4, %c0_5] : memref<8x128xf32, #tpu.memory_space<vmem>>, vector<8x128xf32>
    %c0_6 = arith.constant 0 : index
    %c0_7 = arith.constant 0 : index
    %c0_8 = arith.constant 0 : index
    %6 = vector.load %arg4[%c0_6, %c0_7, %c0_8] : memref<8x8x128xf32, #tpu.memory_space<vmem>>, vector<8x8x128xf32>
    %7 = arith.mulf %3, %3 : vector<8x128xf32>
    %cst = arith.constant dense<0.000000e+00> : vector<8xf32>
    %8 = vector.multi_reduction <add>, %7, %cst [1] : vector<8x128xf32> to vector<8xf32>
    %9 = vector.shape_cast %8 : vector<8xf32> to vector<8x1xf32>
    %cst_9 = arith.constant 1.000000e-30 : f32
    %10 = vector.broadcast %cst_9 : f32 to vector<8x1xf32>
    %11 = arith.maximumf %9, %10 : vector<8x1xf32>
    %12 = math.rsqrt %11 : vector<8x1xf32>
    %13 = arith.mulf %4, %4 : vector<8x128xf32>
    %cst_10 = arith.constant dense<0.000000e+00> : vector<8xf32>
    %14 = vector.multi_reduction <add>, %13, %cst_10 [1] : vector<8x128xf32> to vector<8xf32>
    %15 = vector.shape_cast %14 : vector<8xf32> to vector<8x1xf32>
    %cst_11 = arith.constant 1.000000e-30 : f32
    %16 = vector.broadcast %cst_11 : f32 to vector<8x1xf32>
    %17 = arith.maximumf %15, %16 : vector<8x1xf32>
    %18 = math.rsqrt %17 : vector<8x1xf32>
    %19 = arith.mulf %5, %5 : vector<8x128xf32>
    %cst_12 = arith.constant dense<0.000000e+00> : vector<8xf32>
    %20 = vector.multi_reduction <add>, %19, %cst_12 [1] : vector<8x128xf32> to vector<8xf32>
    %21 = vector.shape_cast %20 : vector<8xf32> to vector<8x1xf32>
    %cst_13 = arith.constant 1.000000e-30 : f32
    %22 = vector.broadcast %cst_13 : f32 to vector<8x1xf32>
    %23 = arith.maximumf %21, %22 : vector<8x1xf32>
    %24 = math.rsqrt %23 : vector<8x1xf32>
    %25 = arith.mulf %6, %6 : vector<8x8x128xf32>
    %cst_14 = arith.constant dense<0.000000e+00> : vector<8x8xf32>
    %26 = vector.multi_reduction <add>, %25, %cst_14 [2] : vector<8x8x128xf32> to vector<8x8xf32>
    %cst_15 = arith.constant 1.000000e-30 : f32
    %27 = vector.broadcast %cst_15 : f32 to vector<8x8xf32>
    %28 = arith.maximumf %26, %27 : vector<8x8xf32>
    %29 = math.rsqrt %28 : vector<8x8xf32>
    %30 = arith.mulf %3, %5 : vector<8x128xf32>
    %cst_16 = arith.constant dense<0.000000e+00> : vector<8xf32>
    %31 = vector.multi_reduction <add>, %30, %cst_16 [1] : vector<8x128xf32> to vector<8xf32>
    %32 = vector.shape_cast %31 : vector<8xf32> to vector<8x1xf32>
    %33 = arith.mulf %4, %5 : vector<8x128xf32>
    %cst_17 = arith.constant dense<0.000000e+00> : vector<8xf32>
    %34 = vector.multi_reduction <add>, %33, %cst_17 [1] : vector<8x128xf32> to vector<8xf32>
    %35 = vector.shape_cast %34 : vector<8xf32> to vector<8x1xf32>
    %36 = vector.shape_cast %3 : vector<8x128xf32> to vector<8x1x128xf32>
    %37 = vector.broadcast %36 : vector<8x1x128xf32> to vector<8x8x128xf32>
    %38 = arith.mulf %37, %6 : vector<8x8x128xf32>
    %cst_18 = arith.constant dense<0.000000e+00> : vector<8x8xf32>
    %39 = vector.multi_reduction <add>, %38, %cst_18 [2] : vector<8x8x128xf32> to vector<8x8xf32>
    %40 = vector.shape_cast %4 : vector<8x128xf32> to vector<8x1x128xf32>
    %41 = vector.broadcast %40 : vector<8x1x128xf32> to vector<8x8x128xf32>
    %42 = arith.mulf %41, %6 : vector<8x8x128xf32>
    %cst_19 = arith.constant dense<0.000000e+00> : vector<8x8xf32>
    %43 = vector.multi_reduction <add>, %42, %cst_19 [2] : vector<8x8x128xf32> to vector<8x8xf32>
    %44 = vector.broadcast %0 : f32 to vector<8x1xf32>
    %45 = arith.mulf %12, %44 : vector<8x1xf32>
    %46 = arith.mulf %32, %45 : vector<8x1xf32>
    %47 = arith.mulf %46, %24 : vector<8x1xf32>
    %48 = vector.broadcast %0 : f32 to vector<8x1xf32>
    %49 = arith.mulf %18, %48 : vector<8x1xf32>
    %50 = arith.mulf %35, %49 : vector<8x1xf32>
    %51 = arith.mulf %50, %24 : vector<8x1xf32>
    %52 = vector.broadcast %0 : f32 to vector<8x1xf32>
    %53 = arith.mulf %12, %52 : vector<8x1xf32>
    %54 = vector.broadcast %53 : vector<8x1xf32> to vector<8x8xf32>
    %55 = arith.mulf %39, %54 : vector<8x8xf32>
    %56 = arith.mulf %55, %29 : vector<8x8xf32>
    %57 = vector.broadcast %0 : f32 to vector<8x1xf32>
    %58 = arith.mulf %18, %57 : vector<8x1xf32>
    %59 = vector.broadcast %58 : vector<8x1xf32> to vector<8x8xf32>
    %60 = arith.mulf %43, %59 : vector<8x8xf32>
    %61 = arith.mulf %60, %29 : vector<8x8xf32>
    %cst_20 = arith.constant 0.000000e+00 : f32
    %62 = arith.cmpf ogt, %2, %cst_20 : f32
    %63 = vector.shape_cast %47 : vector<8x1xf32> to vector<1x8x1xf32>
    %cst_21 = arith.constant dense<0xFF800000> : vector<1xf32>
    %64 = vector.multi_reduction <maximumf>, %63, %cst_21 [1, 2] : vector<1x8x1xf32> to vector<1xf32>
    %65 = vector.shape_cast %64 : vector<1xf32> to vector<1x1x1xf32>
    %66 = vector.extract %65[0, 0, 0] : f32 from vector<1x1x1xf32>
    %67 = vector.broadcast %66 : f32 to vector<1x1xf32>
    %68 = vector.shape_cast %61 : vector<8x8xf32> to vector<1x8x8xf32>
    %cst_22 = arith.constant dense<0xFF800000> : vector<1xf32>
    %69 = vector.multi_reduction <maximumf>, %68, %cst_22 [1, 2] : vector<1x8x8xf32> to vector<1xf32>
    %70 = vector.shape_cast %69 : vector<1xf32> to vector<1x1x1xf32>
    %71 = vector.extract %70[0, 0, 0] : f32 from vector<1x1x1xf32>
    %72 = vector.broadcast %71 : f32 to vector<1x1xf32>
    %cst_23 = arith.constant 0xFF800000 : f32
    %73 = vector.broadcast %cst_23 : f32 to vector<1x1xf32>
    %74 = arith.select %62, %72, %73 : vector<1x1xf32>
    %75 = arith.maximumf %67, %74 : vector<1x1xf32>
    %76 = vector.shape_cast %51 : vector<8x1xf32> to vector<1x8x1xf32>
    %cst_24 = arith.constant dense<0xFF800000> : vector<1xf32>
    %77 = vector.multi_reduction <maximumf>, %76, %cst_24 [1, 2] : vector<1x8x1xf32> to vector<1xf32>
    %78 = vector.shape_cast %77 : vector<1xf32> to vector<1x1x1xf32>
    %79 = vector.extract %78[0, 0, 0] : f32 from vector<1x1x1xf32>
    %80 = vector.broadcast %79 : f32 to vector<1x1xf32>
    %81 = vector.shape_cast %56 : vector<8x8xf32> to vector<1x8x8xf32>
    %cst_25 = arith.constant dense<0xFF800000> : vector<1xf32>
    %82 = vector.multi_reduction <maximumf>, %81, %cst_25 [1, 2] : vector<1x8x8xf32> to vector<1xf32>
    %83 = vector.shape_cast %82 : vector<1xf32> to vector<1x1x1xf32>
    %84 = vector.extract %83[0, 0, 0] : f32 from vector<1x1x1xf32>
    %85 = vector.broadcast %84 : f32 to vector<1x1xf32>
    %86 = arith.maximumf %80, %85 : vector<1x1xf32>
    %87 = vector.broadcast %75 : vector<1x1xf32> to vector<8x8xf32>
    %88 = arith.subf %61, %87 : vector<8x8xf32>
    %cst_26 = arith.constant 0xFF800000 : f32
    %89 = vector.broadcast %cst_26 : f32 to vector<8x8xf32>
    %90 = arith.select %62, %88, %89 : vector<8x8xf32>
    %91 = vector.broadcast %75 : vector<1x1xf32> to vector<8x1xf32>
    %92 = arith.subf %47, %91 : vector<8x1xf32>
    %93 = math.exp %92 : vector<8x1xf32>
    %94 = vector.shape_cast %93 : vector<8x1xf32> to vector<1x8x1xf32>
    %cst_27 = arith.constant dense<0.000000e+00> : vector<1xf32>
    %95 = vector.multi_reduction <add>, %94, %cst_27 [1, 2] : vector<1x8x1xf32> to vector<1xf32>
    %96 = vector.shape_cast %95 : vector<1xf32> to vector<1x1x1xf32>
    %97 = vector.extract %96[0, 0, 0] : f32 from vector<1x1x1xf32>
    %98 = vector.broadcast %97 : f32 to vector<1x1xf32>
    %99 = vector.broadcast %1 : f32 to vector<1x1xf32>
    %100 = arith.mulf %99, %98 : vector<1x1xf32>
    %101 = math.exp %90 : vector<8x8xf32>
    %102 = vector.shape_cast %101 : vector<8x8xf32> to vector<1x8x8xf32>
    %cst_28 = arith.constant dense<0.000000e+00> : vector<1xf32>
    %103 = vector.multi_reduction <add>, %102, %cst_28 [1, 2] : vector<1x8x8xf32> to vector<1xf32>
    %104 = vector.shape_cast %103 : vector<1xf32> to vector<1x1x1xf32>
    %105 = vector.extract %104[0, 0, 0] : f32 from vector<1x1x1xf32>
    %106 = vector.broadcast %105 : f32 to vector<1x1xf32>
    %107 = vector.broadcast %2 : f32 to vector<1x1xf32>
    %108 = arith.mulf %107, %106 : vector<1x1xf32>
    %109 = arith.addf %100, %108 : vector<1x1xf32>
    %110 = vector.broadcast %86 : vector<1x1xf32> to vector<8x1xf32>
    %111 = arith.subf %51, %110 : vector<8x1xf32>
    %112 = math.exp %111 : vector<8x1xf32>
    %113 = vector.shape_cast %112 : vector<8x1xf32> to vector<1x8x1xf32>
    %cst_29 = arith.constant dense<0.000000e+00> : vector<1xf32>
    %114 = vector.multi_reduction <add>, %113, %cst_29 [1, 2] : vector<1x8x1xf32> to vector<1xf32>
    %115 = vector.shape_cast %114 : vector<1xf32> to vector<1x1x1xf32>
    %116 = vector.extract %115[0, 0, 0] : f32 from vector<1x1x1xf32>
    %117 = vector.broadcast %116 : f32 to vector<1x1xf32>
    %118 = vector.broadcast %86 : vector<1x1xf32> to vector<8x8xf32>
    %119 = arith.subf %56, %118 : vector<8x8xf32>
    %120 = math.exp %119 : vector<8x8xf32>
    %121 = vector.shape_cast %120 : vector<8x8xf32> to vector<1x8x8xf32>
    %cst_30 = arith.constant dense<0.000000e+00> : vector<1xf32>
    %122 = vector.multi_reduction <add>, %121, %cst_30 [1, 2] : vector<1x8x8xf32> to vector<1xf32>
    %123 = vector.shape_cast %122 : vector<1xf32> to vector<1x1x1xf32>
    %124 = vector.extract %123[0, 0, 0] : f32 from vector<1x1x1xf32>
    %125 = vector.broadcast %124 : f32 to vector<1x1xf32>
    %126 = arith.addf %117, %125 : vector<1x1xf32>
    %127 = math.log %126 : vector<1x1xf32>
    %128 = arith.addf %127, %86 : vector<1x1xf32>
    %129 = math.log %109 : vector<1x1xf32>
    %130 = arith.addf %129, %75 : vector<1x1xf32>
    %131 = arith.subf %128, %130 : vector<1x1xf32>
    %132 = vector.extract %131[0, 0] : f32 from vector<1x1xf32>
    %c0_31 = arith.constant 0 : index
    %c0_32 = arith.constant 0 : index
    %133 = memref.load %arg5[%c0_31, %c0_32] : memref<1x1xf32, #tpu.memory_space<smem>>
    memref.store %132, %arg5[%c0_31, %c0_32] : memref<1x1xf32, #tpu.memory_space<smem>>
    return
  }
}

</mosaic_0001>

<bundles_post_ra>
// kernel: infonce_loss_pallas.1
= control target key start
LH: loop header
LB: loop body
LE: loop exit
PB: predicated region body
PF: predicated region fallthrough
CT: control target
= control target key end

     0   :  { %10 = vsyncpa [#allocation5], 0  ;;  %s1380_s0 = inlined_call_operand.vmem [shape: f32[3], index: 0, kind: input, shape index: {}]   ;;  %s1381_s1 = inlined_call_operand.vmem [shape: f32[8,128], index: 1, kind: input, shape index: {}]   ;;  %s1382_s2 = inlined_call_operand.vmem [shape: f32[8,128], index: 2, kind: input, shape index: {}]   ;;  %s1383_s3 = inlined_call_operand.vmem [shape: f32[8,128], index: 3, kind: input, shape index: {}]   ;;  %s1384_s4 = inlined_call_operand.hbm [shape: f32[8,8,128], index: 4, kind: input, shape index: {}]   ;;  %s1385_s5 = inlined_call_operand.hbm [shape: f32[1,1], index: 5, kind: output, shape index: {}]  }
   0x1   :  { %11 = vsyncpa [#allocation3], 0 }
   0x2   :  { %12 = vsyncpa [#allocation4], 0  ;;  %s19_s20 = sshll.u32 %s1380_s0, 4  ;;  %s20_s20 = int_to_ptr.vmem [resolvable:$true] %s19_s20 }
   0x3   :  { %s926_s21 = scalar_lea.vmem %s20_s20, 16  ;;  %p931_p1 = scmp.lt.s32.totalorder %s20_s20, %s20_s20 }
   0x4   :  { %p927_p0 = scmp.ne.s32.totalorder %s20_s20, %s926_s21  ;;  %p932_p2 = scmp.lt.s32.totalorder %s926_s21, %s926_s21 }
   0x6   :  { %p933_p3 = por %p932_p2, %p931_p1 }
   0x8   :  { %p934_p4 = pnand %p933_p3, %p927_p0 }
   0xa   :  { %937 = shalt.err (!%p934_p4)
}
   0xb   :  { %s976_s22 = smov [#allocation2]   ;;  %s977_s23 = smov [#allocation6]  }
   0xc   :  { %22 = dma.vmem_to_smem %s20_s20, 16, %s976_s22, [#allocation5]  }
   0xd   :  { %s34_s24 = sshll.u32 %s977_s23, 4  ;;  %s938_s27 = scalar_lea.hbm %s1384_s4, 1024  ;;  %s35_s24 = int_to_ptr.vmem [resolvable:$true] %s34_s24 }
   0xe   :  { %p939_p5 = scmp.ne.s32.totalorder %s1384_s4, %s938_s27  ;;  %p942_p6 = scmp.lt.u32.totalorder %s938_s27, %s1384_s4 }
  0x10   :  { %p944_p7 = pnand %p942_p6, %p939_p5 }
  0x12   :  { %947 = shalt.err (!%p944_p7)
}
  0x13   :  { %s948_s6 = scalar_lea.vmem %s35_s24, 1024  ;;  %p953_p9 = scmp.lt.s32.totalorder %s35_s24, %s35_s24 }
  0x14   :  { %p949_p8 = scmp.ne.s32.totalorder %s35_s24, %s948_s6  ;;  %p954_p10 = scmp.lt.s32.totalorder %s948_s6, %s948_s6 }
  0x16   :  { %p955_p11 = por %p954_p10, %p953_p9 }
  0x18   :  { %p956_p12 = pnand %p955_p11, %p949_p8 }
  0x1a   :  { %959 = shalt.err (!%p956_p12)
}
  0x1b   :  { %s978_s7 = smov 128   ;;  %s979_s8 = smov 8  }
  0x1c   :  { %40 = dma.hbm_to_vmem [thread:$0]  %s1384_s4, 1024, %s35_s24, [#allocation3], %s978_s7, %s978_s7, %s979_s8  }
  0x1d   :  { %970 = dma.done.wait [#allocation5], 16  }
  0x1e   :  { %971 = vsyncadd [#allocation5], 4294967280 }
  0x1f   :  { %972 = dma.done.wait [#allocation3], 1024  }
  0x20   :  { %973 = vsyncadd [#allocation3], 4294966272 }
  0x21   :  { %47 = sfence }
  0x22   :  { %v1028_v0 = vld [vmem:[#allocation6] sm:$0xff]  ;;  %v1035_v2 = vld [vmem:[#allocation6 + $0x8] sm:$0xff]  ;;  %v128_v3 = vlaneseq  ;;  %v980_v7 = vmov 1966171168   ;;  %v1053_v12 = vld [vmem:[#allocation6 + $0x18] sm:$0xff]  ;;  %vm481_vm0 = vcmask 7168  }
  0x23   :  { %v1033_v1 = vld [vmem:[%s1382_s2] sm:$0xff]  ;;  %v77_v4 = vmul.f32 %v1028_v0, %v1028_v0  ;;  %v126_v8 = vunpack.c.l.s4 %v980_v7  ;;  %v78_v9 = vmul.f32 %v1035_v2, %v1035_v2  ;;  %v1055_v13 = vld [vmem:[#allocation6 + $0x10] sm:$0xff]  ;;  %v80_v16 = vmul.f32 %v1053_v12, %v1053_v12  ;;  %v1064_v18 = vld [vmem:[#allocation6 + $0x28] sm:$0xff]  ;;  %s1294_s14 = sld [smem:[#allocation2 + $0x2]]  ;;  %s833_s20 = sld [smem:[#allocation2 + $0x1]] }
  0x24   :  { %v67_v5 = vmul.f32 %v1033_v1, %v1033_v1  ;;  %v1044_v6 = vld [vmem:[%s1381_s1] sm:$0xff]  ;;  %v1051_v11 = vshrl.u32 %v128_v3, 7  ;;  %v79_v17 = vmul.f32 %v1055_v13, %v1055_v13  ;;  %v238_v21 = vcombine.high %v1033_v1, %v1033_v1  ;;  %v1080_v26 = vld [vmem:[#allocation6 + $0x38] sm:$0xff]  ;;  %v1082_v28 = vld [vmem:[#allocation6 + $0x30] sm:$0xff]  ;;  %s960_s28 = scalar_lea.hbm %s1385_s5, 16 }
  0x25   :  { %85 = vadd.xlane.f32.xlu1 %v77_v4  ;;  %v62_v10 = vmul.f32 %v1044_v6, %v1044_v6  ;;  %v127_v14 = vunpack.c.0.s8 %v126_v8  ;;  %v1066_v19 = vld [vmem:[#allocation6 + $0x20] sm:$0xff]  ;;  %v82_v24 = vmul.f32 %v1064_v18, %v1064_v18  ;;  %v84_v29 = vmul.f32 %v1080_v26, %v1080_v26  ;;  %p961_p0 = scmp.ne.s32.totalorder %s1385_s5, %s960_s28  ;;  %p964_p1 = scmp.lt.u32.totalorder %s960_s28, %s1385_s5 }
  0x26   :  { %68 = vadd.xlane.f32.xlu0 %v67_v5  ;;  %v1073_v22 = vsub.s32 0, %v1051_v11  ;;  %v81_v25 = vmul.f32 %v1066_v19, %v1066_v19  ;;  %v83_v32 = vmul.f32 %v1082_v28, %v1082_v28  ;;  %v1093_v33 = vld [vmem:[%s1383_s3] sm:$0xff]  ;;  %v124_v50 = vcombine.high %v1044_v6, %v1044_v6  ;;  %s1144_s3 = sld [smem:[#allocation2]] }
  0x27   :  { %v1058_v15 = vsub.s32 %v127_v14, %v1051_v11  ;;  %v72_v37 = vmul.f32 %v1093_v33, %v1093_v33  ;;  %vm656_vm2 = vcmask 1041409   ;;  %vm658_vm3 = vcmask 1042434   ;;  %p966_p2 = pnand %p964_p1, %p961_p0 }
  0x28   :  { %vm660_vm4 = vcmask 1043459   ;;  %vm662_vm5 = vcmask 1044484   ;;  %vm664_vm6 = vcmask 1045509   ;;  %vm666_vm7 = vcmask 1046534  }
  0x29   :  { %87 = vadd.xlane.f32.xlu1 %v78_v9  ;;  %v245_v20 = vrot.slane %v1033_v1, %v1058_v15  ;;  %v252_v31 = vrot.slane %v238_v21, %v1058_v15  ;;  %v131_v46 = vrot.slane %v1044_v6, %v1058_v15  ;;  %v138_v61 = vrot.slane %v124_v50, %v1058_v15  ;;  %p472_p13 = scmp.gt.f32.partialorder %s1294_s14, 0.0 }
  0x2a   :  { %63 = vadd.xlane.f32.xlu0 %v62_v10  ;;  %vm668_vm8 = vcmask 1047559   ;;  %vm671_vm9 = vcmask 64512  }
  0x2b   :  { %v261_v23 = vrot.slane %v245_v20, %v1058_v15  ;;  %v253_v27 = vcombine.high %v245_v20, %v245_v20  ;;  %v268_v38 = vrot.slane %v252_v31, %v1058_v15  ;;  %v254_v39 = vcombine.high %v252_v31, %v252_v31  ;;  %s505_s15 = scalar_select %p472_p13, 1, 0 }
  0x2c   :  { %v147_v53 = vrot.slane %v131_v46, %v1058_v15  ;;  %v139_v54 = vcombine.high %v131_v46, %v131_v46  ;;  %v154_v8 = vrot.slane %v138_v61, %v1058_v15  ;;  %v140_v9 = vcombine.high %v138_v61, %v138_v61 }
  0x2d   :  { %91 = vadd.xlane.f32.xlu1 %v80_v16  ;;  %v290_v30 = vrot.slane %v261_v23, %v1073_v22  ;;  %v283_v34 = vcombine.high %v261_v23, %v261_v23  ;;  %v275_v35 = vrot.slane %v253_v27, %v1058_v15  ;;  %v306_v43 = vrot.slane %v268_v38, %v1073_v22 }
  0x2e   :  { %89 = vadd.xlane.f32.xlu0 %v79_v17  ;;  %v284_v44 = vcombine.high %v268_v38, %v268_v38  ;;  %v282_v45 = vrot.slane %v254_v39, %v1058_v15  ;;  %v176_v59 = vrot.slane %v147_v53, %v1073_v22  ;;  %v169_v60 = vcombine.high %v147_v53, %v147_v53 }
  0x2f   :  { %v327_v36 = vmul.f32 %v290_v30, %v1028_v0  ;;  %v298_v40 = vrot.slane %v283_v34, %v1073_v22  ;;  %v294_v41 = vrot.slane %v275_v35, %v1073_v22  ;;  %v285_v42 = vcombine.high %v275_v35, %v275_v35 }
  0x30   :  { %v331_v51 = vmul.f32 %v306_v43, %v1066_v19  ;;  %v314_v52 = vrot.slane %v284_v44, %v1073_v22  ;;  %v310_v56 = vrot.slane %v282_v45, %v1073_v22  ;;  %v286_v57 = vcombine.high %v282_v45, %v282_v45 }
  0x31   :  { %95 = vadd.xlane.f32.xlu1 %v82_v24  ;;  %v329_v47 = vmul.f32 %v298_v40, %v1055_v13  ;;  %v328_v48 = vmul.f32 %v294_v41, %v1035_v2  ;;  %v302_v49 = vrot.slane %v285_v42, %v1073_v22  ;;  %v161_v4 = vrot.slane %v139_v54, %v1058_v15 }
  0x32   :  { %93 = vadd.xlane.f32.xlu0 %v81_v25  ;;  %v333_v58 = vmul.f32 %v314_v52, %v1082_v28  ;;  %v332_v62 = vmul.f32 %v310_v56, %v1064_v18  ;;  %v318_v63 = vrot.slane %v286_v57, %v1073_v22  ;;  %v213_v5 = vmul.f32 %v176_v59, %v1028_v0 }
  0x33   :  { %v330_v55 = vmul.f32 %v302_v49, %v1053_v12  ;;  %v184_v7 = vrot.slane %v169_v60, %v1073_v22  ;;  %v180_v14 = vrot.slane %v161_v4, %v1073_v22  ;;  %v171_v16 = vcombine.high %v161_v4, %v161_v4 }
  0x34   :  { %v334_v10 = vmul.f32 %v318_v63, %v1080_v26  ;;  %v192_v20 = vrot.slane %v154_v8, %v1073_v22  ;;  %v170_v21 = vcombine.high %v154_v8, %v154_v8  ;;  %v168_v24 = vrot.slane %v140_v9, %v1058_v15 }
  0x35   :  { %99 = vadd.xlane.f32.xlu1 %v84_v29  ;;  %v215_v17 = vmul.f32 %v184_v7, %v1055_v13  ;;  %v214_v0 = vmul.f32 %v180_v14, %v1035_v2  ;;  %v188_v23 = vrot.slane %v171_v16, %v1073_v22  ;;  %v117_v15 = vmul.f32 %v1093_v33, %v1044_v6 }
  0x36   :  { %97 = vadd.xlane.f32.xlu0 %v83_v32  ;;  %v217_v25 = vmul.f32 %v192_v20, %v1066_v19  ;;  %v200_v27 = vrot.slane %v170_v21, %v1073_v22  ;;  %v196_v13 = vrot.slane %v168_v24, %v1073_v22  ;;  %v172_v30 = vcombine.high %v168_v24, %v168_v24 }
  0x37   :  { %v216_v29 = vmul.f32 %v188_v23, %v1053_v12  ;;  %v120_v12 = vmul.f32 %v1093_v33, %v1033_v1  ;;  %v351_v49 = vstv %s1144_s3  ;;  %v365_v56 = vsub.s32 1, %v1051_v11 }
  0x38   :  { %v219_v31 = vmul.f32 %v200_v27, %v1082_v28  ;;  %v218_v2 = vmul.f32 %v196_v13, %v1064_v18  ;;  %v204_v32 = vrot.slane %v172_v30, %v1073_v22  ;;  %v981_v28 = vmov 0  }
  0x39   :  { %335 = vadd.xlane.f32.xlu1 %v327_v36  ;;  %861 = vset.pattern.permute.xlu0 %v981_v28  ;;  %v377_v57 = vsub.s32 4, %v1051_v11  ;;  %v373_v59 = vsub.s32 3, %v1051_v11  ;;  %v385_v60 = vsub.s32 6, %v1051_v11  ;;  %v381_v61 = vsub.s32 5, %v1051_v11 }
  0x3a   :  { %73 = vadd.xlane.f32.xlu0 %v72_v37  ;;  %v220_v19 = vmul.f32 %v204_v32, %v1080_v26  ;;  %860 = vset.pattern.permute.xlu1 %v981_v28  ;;  %v389_v14 = vsub.s32 7, %v1051_v11 }
  0x3d   :  { %339 = vadd.xlane.f32.xlu1 %v329_v47 }
  0x3e   :  { %337 = vadd.xlane.f32.xlu0 %v328_v48 }
  0x41   :  { %343 = vadd.xlane.f32.xlu1 %v331_v51 }
  0x42   :  { %341 = vadd.xlane.f32.xlu0 %v330_v55 }
  0x45   :  { %347 = vadd.xlane.f32.xlu1 %v333_v58  ;;  %v369_v58 = vsub.s32 2, %v1051_v11 }
  0x46   :  { %345 = vadd.xlane.f32.xlu0 %v332_v62 }
  0x49   :  { %221 = vadd.xlane.f32.xlu1 %v213_v5 }
  0x4a   :  { %349 = vadd.xlane.f32.xlu0 %v334_v10 }
  0x4d   :  { %225 = vadd.xlane.f32.xlu1 %v215_v17 }
  0x4e   :  { %223 = vadd.xlane.f32.xlu0 %v214_v0 }
  0x51   :  { %229 = vadd.xlane.f32.xlu1 %v217_v25 }
  0x52   :  { %227 = vadd.xlane.f32.xlu0 %v216_v29 }
  0x55   :  { %233 = vadd.xlane.f32.xlu1 %v219_v31 }
  0x56   :  { %231 = vadd.xlane.f32.xlu0 %v218_v2 }
  0x59   :  { %118 = vadd.xlane.f32.xlu1 %v117_v15 }
  0x5a   :  { %235 = vadd.xlane.f32.xlu0 %v220_v19 }
  0x5e   :  { %121 = vadd.xlane.f32.xlu0 %v120_v12 }
  0xb2   :  { %v86_v34 = vpop.xlane.xlu1 %85 }
  0xb3   :  { %v69_v35 = vpop.xlane.xlu0 %68  ;;  %v101_v26 = vmax.f32 %v86_v34, 1e-30 }
  0xb4   :  { %v70_v37 = vmax.f32 %v69_v35, 1e-30 }
  0xb6   :  { %v88_v18 = vpop.xlane.xlu1 %87  ;;  %864 = vrsqrt.f32 %v70_v37 }
  0xb7   :  { %v64_v36 = vpop.xlane.xlu0 %63  ;;  %v102_v33 = vmax.f32 %v88_v18, 1e-30  ;;  %866 = vrsqrt.f32 %v101_v26 }
  0xb8   :  { %v65_v51 = vmax.f32 %v64_v36, 1e-30 }
  0xb9   :  { %868 = vrsqrt.f32 %v102_v33 }
  0xba   :  { %v92_v38 = vpop.xlane.xlu1 %91 }
  0xbb   :  { %v90_v39 = vpop.xlane.xlu0 %89  ;;  %v104_v47 = vmax.f32 %v92_v38, 1e-30 }
  0xbc   :  { %v103_v50 = vmax.f32 %v90_v39, 1e-30 }
  0xbe   :  { %v96_v6 = vpop.xlane.xlu1 %95 }
  0xbf   :  { %v94_v40 = vpop.xlane.xlu0 %93  ;;  %v106_v42 = vmax.f32 %v96_v6, 1e-30 }
  0xc0   :  { %v105_v43 = vmax.f32 %v94_v40, 1e-30  ;;  %v865_v48 = vpop.eup %864 }
  0xc1   :  { %870 = vrsqrt.f32 %v106_v42  ;;  %v1151_v55 = vmul.f32 %v865_v48, %v351_v49  ;;  %v1165_v7 = vpop.eup %866 }
  0xc2   :  { %v100_v41 = vpop.xlane.xlu1 %99  ;;  %872 = vrsqrt.f32 %v105_v43 }
  0xc3   :  { %v98_v1 = vpop.xlane.xlu0 %97  ;;  %v108_v52 = vmax.f32 %v100_v41, 1e-30  ;;  %v423_v4 = vrot.slane %v1151_v55, %v365_v56  ;;  %v435_v5 = vrot.slane %v1151_v55, %v377_v57  ;;  %v419_v8 = vrot.slane %v1151_v55, %v1073_v22  ;;  %v1176_v16 = vpop.eup %868 }
  0xc4   :  { %v107_v44 = vmax.f32 %v98_v1, 1e-30  ;;  %v427_v9 = vrot.slane %v1151_v55, %v369_v58  ;;  %v431_v10 = vrot.slane %v1151_v55, %v373_v59  ;;  %v443_v21 = vrot.slane %v1151_v55, %v385_v60 }
  0xc5   :  { %v439_v0 = vrot.slane %v1151_v55, %v381_v61  ;;  %v447_v15 = vrot.slane %v1151_v55, %v389_v14 }
  0xc6   :  { %v336_v45 = vpop.xlane.xlu1 %335  ;;  %874 = vrsqrt.f32 %v107_v44 }
  0xc7   :  { %v1146_v46 = vpop.xlane.xlu0 %73  ;;  %876 = vrsqrt.f32 %v104_v47  ;;  %v456_v24 = vmul.f32 %v419_v8, %v336_v45 }
  0xc8   :  { %878 = vrsqrt.f32 %v103_v50  ;;  %v75_v47 = vmax.f32 %v1146_v46, 1e-30 }
  0xc9   :  { %880 = vrsqrt.f32 %v65_v51  ;;  %v1205_v36 = vmul.f32 %v1165_v7, %v456_v24 }
  0xca   :  { %v340_v53 = vpop.xlane.xlu1 %339  ;;  %882 = vrsqrt.f32 %v108_v52 }
  0xcb   :  { %v338_v54 = vpop.xlane.xlu0 %337  ;;  %v1184_v23 = vpop.eup %870  ;;  %v458_v13 = vmul.f32 %v427_v9, %v340_v53  ;;  %v482_v52 = vsel %vm481_vm0, %v1205_v36, -inf  ;;  %884 = vrsqrt.f32 %v75_v47 }
  0xcc   :  { %v457_v17 = vmul.f32 %v423_v4, %v338_v54  ;;  %v1186_v29 = vpop.eup %872 }
  0xce   :  { %v344_v62 = vpop.xlane.xlu1 %343  ;;  %v1194_v12 = vmul.f32 %v1176_v16, %v457_v17 }
  0xcf   :  { %v342_v63 = vpop.xlane.xlu0 %341  ;;  %v460_v20 = vmul.f32 %v435_v5, %v344_v62 }
  0xd0   :  { %v459_v30 = vmul.f32 %v431_v10, %v342_v63  ;;  %v875_v32 = vpop.eup %874  ;;  %v483_v33 = vsel %vm481_vm0, %v1194_v12, -inf }
  0xd1   :  { %v1191_v19 = vpop.eup %876  ;;  %v1197_v34 = vmul.f32 %v1186_v29, %v460_v20 }
  0xd2   :  { %v348_v25 = vpop.xlane.xlu1 %347  ;;  %v879_v18 = vpop.eup %878  ;;  %v1210_v40 = vmul.f32 %v1191_v19, %v459_v30 }
  0xd3   :  { %v346_v27 = vpop.xlane.xlu0 %345  ;;  %v462_v31 = vmul.f32 %v443_v21, %v348_v25  ;;  %v881_v39 = vpop.eup %880  ;;  %v1207_v6 = vmul.f32 %v879_v18, %v458_v13  ;;  %v486_v42 = vsel %vm481_vm0, %v1197_v34, -inf }
  0xd4   :  { %v461_v2 = vmul.f32 %v439_v0, %v346_v27  ;;  %v883_v1 = vpop.eup %882  ;;  %v352_v45 = vmul.f32 %v881_v39, %v351_v49  ;;  %v485_v54 = vsel %vm481_vm0, %v1210_v40, -inf  ;;  %v487_v63 = vmax.f32 %v482_v52, %v486_v42 }
  0xd5   :  { %v1199_v35 = vmul.f32 %v875_v32, %v462_v31  ;;  %v484_v53 = vsel %vm481_vm0, %v1207_v6, -inf  ;;  %v885_v47 = vpop.eup %884 }
  0xd6   :  { %v1202_v28 = vmul.f32 %v1184_v23, %v461_v2  ;;  %v222_v37 = vpop.xlane.xlu1 %221  ;;  %v366_v8 = vrot.slane %v352_v45, %v365_v56  ;;  %v378_v17 = vrot.slane %v352_v45, %v377_v57  ;;  %v362_v20 = vrot.slane %v352_v45, %v1073_v22 }
  0xd7   :  { %v350_v38 = vpop.xlane.xlu0 %349  ;;  %v490_v43 = vsel %vm481_vm0, %v1199_v35, -inf  ;;  %v370_v21 = vrot.slane %v352_v45, %v369_v58  ;;  %v374_v27 = vrot.slane %v352_v45, %v373_v59  ;;  %v386_v13 = vrot.slane %v352_v45, %v385_v60 }
  0xd8   :  { %v488_v26 = vsel %vm481_vm0, %v1202_v28, -inf  ;;  %v463_v41 = vmul.f32 %v447_v15, %v350_v38  ;;  %v491_v4 = vmax.f32 %v484_v53, %v490_v43  ;;  %v382_v56 = vrot.slane %v352_v45, %v381_v61 }
  0xd9   :  { %v489_v48 = vmax.f32 %v483_v33, %v488_v26  ;;  %v399_v30 = vmul.f32 %v362_v20, %v222_v37  ;;  %v390_v61 = vrot.slane %v352_v45, %v389_v14 }
  0xda   :  { %v1220_v44 = vmul.f32 %v883_v1, %v463_v41  ;;  %v226_v50 = vpop.xlane.xlu1 %225 }
  0xdb   :  { %v224_v51 = vpop.xlane.xlu0 %223  ;;  %v494_v46 = vmax.f32 %v487_v63, %v489_v48  ;;  %v401_v31 = vmul.f32 %v370_v21, %v226_v50  ;;  %v1260_v37 = vmul.f32 %v1165_v7, %v399_v30 }
  0xdc   :  { %v492_v62 = vsel %vm481_vm0, %v1220_v44, -inf  ;;  %v400_v0 = vmul.f32 %v366_v8, %v224_v51 }
  0xdd   :  { %v493_v49 = vmax.f32 %v485_v54, %v492_v62  ;;  %v1262_v41 = vmul.f32 %v879_v18, %v401_v31 }
  0xde   :  { %v230_v9 = vpop.xlane.xlu1 %229  ;;  %v1247_v39 = vmul.f32 %v1176_v16, %v400_v0 }
  0xdf   :  { %v495_v5 = vmax.f32 %v491_v4, %v493_v49  ;;  %v228_v10 = vpop.xlane.xlu0 %227  ;;  %v403_v25 = vmul.f32 %v378_v17, %v230_v9 }
  0xe0   :  { %v402_v15 = vmul.f32 %v374_v27, %v228_v10  ;;  %v519_v14 = vsel %vm481_vm0, %v1247_v39, -inf }
  0xe1   :  { %v496_v24 = vmax.f32 %v494_v46, %v495_v5  ;;  %v1250_v26 = vmul.f32 %v1186_v29, %v403_v25 }
  0xe2   :  { %v234_v57 = vpop.xlane.xlu1 %233  ;;  %v1265_v43 = vmul.f32 %v1191_v19, %v402_v15  ;;  %v518_v19 = vsel %vm481_vm0, %v1260_v37, -inf }
  0xe3   :  { %v232_v2 = vpop.xlane.xlu0 %231  ;;  %v497_v22 = vrot.slane %v496_v24, 4  ;;  %v405_v38 = vmul.f32 %v386_v13, %v234_v57  ;;  %v522_v7 = vsel %vm481_vm0, %v1250_v26, -inf }
  0xe4   :  { %v404_v58 = vmul.f32 %v382_v56, %v232_v2  ;;  %v521_v54 = vsel %vm481_vm0, %v1265_v43, -inf  ;;  %v523_v4 = vmax.f32 %v518_v19, %v522_v7 }
  0xe5   :  { %v1252_v59 = vmul.f32 %v875_v32, %v405_v38  ;;  %v498_v16 = vmax.f32 %v496_v24, %v497_v22 }
  0xe6   :  { %v1255_v60 = vmul.f32 %v1184_v23, %v404_v58  ;;  %v119_v33 = vpop.xlane.xlu1 %118 }
  0xe7   :  { %v236_v42 = vpop.xlane.xlu0 %235  ;;  %v353_v32 = vmul.f32 %v352_v45, %v119_v33  ;;  %v526_v18 = vsel %vm481_vm0, %v1252_v59, -inf  ;;  %v520_v45 = vsel %vm481_vm0, %v1262_v41, -inf  ;;  %v499_v53 = vrot.slane %v498_v16, 2 }
  0xe8   :  { %v524_v29 = vsel %vm481_vm0, %v1255_v60, -inf  ;;  %v406_v23 = vmul.f32 %v390_v61, %v236_v42  ;;  %v527_v49 = vmax.f32 %v520_v45, %v526_v18  ;;  %v506_v42 = vstv %s505_s15 }
  0xe9   :  { %v1275_v48 = vmul.f32 %v885_v47, %v353_v32  ;;  %v525_v51 = vmax.f32 %v519_v14, %v524_v29  ;;  %v500_v17 = vmax.f32 %v498_v16, %v499_v53  ;;  %vm1297_vm1 = vcmp.eq.s32.totalorder %v506_v42, 1 }
  0xea   :  { %v1277_v50 = vmul.f32 %v883_v1, %v406_v23 }
  0xeb   :  { %v122_v52 = vpop.xlane.xlu0 %121  ;;  %v473_v1 = vrot.slane %v1275_v48, 4  ;;  %v530_v9 = vmax.f32 %v523_v4, %v525_v51 }
  0xec   :  { %v528_v62 = vsel %vm481_vm0, %v1277_v50, -inf  ;;  %v356_v63 = vmul.f32 %v1151_v55, %v122_v52  ;;  %v501_v55 = vrot.slane %v500_v17, 1 }
  0xed   :  { %v529_v46 = vmax.f32 %v521_v54, %v528_v62  ;;  %v474_v8 = vmax.f32 %v1275_v48, %v473_v1 }
  0xee   :  { %v1289_v5 = vmul.f32 %v885_v47, %v356_v63  ;;  %v502_v2 = vmax.f32 %v500_v17, %v501_v55 }
  0xef   :  { %v531_v10 = vmax.f32 %v527_v49, %v529_v46  ;;  %v475_v21 = vrot.slane %v474_v8, 2 }
  0xf0   :  { %v510_v20 = vrot.slane %v1289_v5, 4 }
  0xf1   :  { %v532_v0 = vmax.f32 %v530_v9, %v531_v10  ;;  %v476_v24 = vmax.f32 %v474_v8, %v475_v21 }
  0xf2   :  { %v511_v25 = vmax.f32 %v1289_v5, %v510_v20 }
  0xf3   :  { %v533_v27 = vrot.slane %v532_v0, 4  ;;  %v477_v13 = vrot.slane %v476_v24, 1 }
  0xf4   :  { %v512_v56 = vrot.slane %v511_v25, 2 }
  0xf5   :  { %v534_v30 = vmax.f32 %v532_v0, %v533_v27  ;;  %v478_v31 = vmax.f32 %v476_v24, %v477_v13 }
  0xf6   :  { %v513_v57 = vmax.f32 %v511_v25, %v512_v56 }
  0xf7   :  { %v535_v22 = vrot.slane %v534_v30, 2  ;;  %835 = vpush %v478_v31 }
  0xf8   :  { %v514_v15 = vrot.slane %v513_v57, 1  ;;  %837 = vpush %v502_v2 }
  0xf9   :  { %v536_v38 = vmax.f32 %v534_v30, %v535_v22 }
  0xfa   :  { %v515_v58 = vmax.f32 %v513_v57, %v514_v15 }
  0xfb   :  { %v537_v61 = vrot.slane %v536_v38, 1 }
  0xfc   :  { %839 = vpush %v515_v58 }
  0xfd   :  { %v538_v33 = vmax.f32 %v536_v38, %v537_v61 }
  0xff   :  { %841 = vpush %v538_v33 }
 0x128   :  { %s836_s16 = spop %835 }
 0x129   :  { %v480_v29 = vstv %s836_s16  ;;  %s838_s17 = spop %837 }
 0x12a   :  { %v504_v32 = vstv %s838_s17 }
 0x12b   :  { %v508_v23 = vsel %vm1297_vm1, %v504_v32, -inf }
 0x12c   :  { %v1303_v47 = vmax.f32 %v480_v29, %v508_v23 }
 0x12d   :  { %s840_s18 = spop %839 }
 0x12e   :  { %v543_v14 = vsub.f32 %v1194_v12, %v1303_v47  ;;  %v548_v7 = vsub.f32 %v1199_v35, %v1303_v47  ;;  %v549_v18 = vsub.f32 %v1220_v44, %v1303_v47  ;;  %v517_v19 = vstv %s840_s18 }
 0x12f   :  { %v544_v27 = vsub.f32 %v1207_v6, %v1303_v47  ;;  %v545_v56 = vsub.f32 %v1210_v40, %v1303_v47  ;;  %v546_v57 = vsub.f32 %v1197_v34, %v1303_v47  ;;  %v558_v22 = vsub.f32 %v1275_v48, %v1303_v47 }
 0x130   :  { %s842_s19 = spop %841  ;;  %v551_v51 = vsel %vm1297_vm1, %v543_v14, -inf  ;;  %v556_v52 = vsel %vm1297_vm1, %v548_v7, -inf  ;;  %v557_v35 = vsel %vm1297_vm1, %v549_v18, -inf  ;;  %v547_v38 = vsub.f32 %v1202_v28, %v1303_v47 }
 0x131   :  { %v540_v45 = vstv %s842_s19  ;;  %v576_v54 = vmul.f32 1.442695, %v551_v51  ;;  %v586_v62 = vmul.f32 1.442695, %v556_v52  ;;  %v588_v1 = vmul.f32 1.442695, %v557_v35 }
 0x132   :  { %v1315_v53 = vmax.f32 %v517_v19, %v540_v45  ;;  %v553_v6 = vsel %vm1297_vm1, %v545_v56, -inf  ;;  %v554_v40 = vsel %vm1297_vm1, %v546_v57, -inf  ;;  %v559_v34 = vmul.f32 1.442695, %v558_v22 }
 0x133   :  { %886 = vpow2.f32 %v576_v54  ;;  %v580_v15 = vmul.f32 1.442695, %v553_v6  ;;  %v582_v61 = vmul.f32 1.442695, %v554_v40  ;;  %v555_v33 = vsel %vm1297_vm1, %v547_v38, -inf }
 0x134   :  { %v700_v12 = vsub.f32 %v1260_v37, %v1315_v53  ;;  %v701_v44 = vsub.f32 %v1247_v39, %v1315_v53  ;;  %888 = vpow2.f32 %v586_v62  ;;  %v706_v4 = vsub.f32 %v1252_v59, %v1315_v53 }
 0x135   :  { %v702_v46 = vsub.f32 %v1262_v41, %v1315_v53  ;;  %v703_v9 = vsub.f32 %v1265_v43, %v1315_v53  ;;  %v704_v59 = vsub.f32 %v1250_v26, %v1315_v53  ;;  %v705_v21 = vsub.f32 %v1255_v60, %v1315_v53 }
 0x136   :  { %v708_v63 = vmul.f32 1.442695, %v700_v12  ;;  %v710_v49 = vmul.f32 1.442695, %v701_v44  ;;  %v720_v8 = vmul.f32 1.442695, %v706_v4  ;;  %v542_v43 = vsub.f32 %v1205_v36, %v1303_v47 }
 0x137   :  { %v712_v37 = vmul.f32 1.442695, %v702_v46  ;;  %v714_v39 = vmul.f32 1.442695, %v703_v9  ;;  %v716_v41 = vmul.f32 1.442695, %v704_v59  ;;  %v686_v42 = vsub.f32 %v1289_v5, %v1315_v53 }
 0x138   :  { %890 = vpow2.f32 %v708_v63  ;;  %v718_v25 = vmul.f32 1.442695, %v705_v21  ;;  %v550_v26 = vsel %vm1297_vm1, %v542_v43, -inf  ;;  %v552_v36 = vsel %vm1297_vm1, %v544_v27, -inf }
 0x139   :  { %892 = vpow2.f32 %v588_v1  ;;  %v574_v60 = vmul.f32 1.442695, %v550_v26  ;;  %v578_v31 = vmul.f32 1.442695, %v552_v36  ;;  %v584_v29 = vmul.f32 1.442695, %v555_v33 }
 0x13a   :  { %894 = vpow2.f32 %v710_v49  ;;  %v687_v32 = vmul.f32 1.442695, %v686_v42  ;;  %v707_v28 = vsub.f32 %v1277_v50, %v1315_v53  ;;  %v623_v49 = vand.u32 127, %v128_v3 }
 0x13b   :  { %896 = vpow2.f32 %v720_v8 }
 0x13c   :  { %898 = vpow2.f32 %v712_v37  ;;  %v722_v14 = vmul.f32 1.442695, %v707_v28  ;;  %v626_v37 = vsub.s32 %v623_v49, %v1051_v11 }
 0x13d   :  { %v887_v10 = vpop.eup %886  ;;  %900 = vpow2.f32 %v714_v39 }
 0x13e   :  { %602 = vperm.xlu0 %861, %v887_v10   ;;  %v889_v17 = vpop.eup %888  ;;  %902 = vpow2.f32 %v716_v41 }
 0x13f   :  { %904 = vpow2.f32 %v718_v25 }
 0x140   :  { %906 = vpow2.f32 %v574_v60 }
 0x141   :  { %908 = vpow2.f32 %v578_v31 }
 0x142   :  { %v891_v20 = vpop.eup %890  ;;  %617 = vperm.xlu0 %861, %v889_v17   ;;  %910 = vpow2.f32 %v580_v15 }
 0x143   :  { %733 = vperm.xlu1 %860, %v891_v20   ;;  %v893_v0 = vpop.eup %892  ;;  %912 = vpow2.f32 %v582_v61 }
 0x144   :  { %v895_v24 = vpop.eup %894  ;;  %914 = vpow2.f32 %v559_v34 }
 0x145   :  { %v897_v55 = vpop.eup %896  ;;  %916 = vpow2.f32 %v584_v29 }
 0x146   :  { %620 = vperm.xlu0 %861, %v893_v0   ;;  %v899_v13 = vpop.eup %898  ;;  %918 = vpow2.f32 %v687_v32 }
 0x147   :  { %736 = vperm.xlu1 %860, %v895_v24   ;;  %v901_v30 = vpop.eup %900  ;;  %920 = vpow2.f32 %v722_v14 }
 0x148   :  { %v903_v2 = vpop.eup %902 }
 0x149   :  { %v905_v58 = vpop.eup %904 }
 0x14a   :  { %751 = vperm.xlu0 %861, %v897_v55   ;;  %v907_v48 = vpop.eup %906 }
 0x14b   :  { %739 = vperm.xlu1 %860, %v899_v13   ;;  %v909_v23 = vpop.eup %908 }
 0x14c   :  { %v911_v7 = vpop.eup %910 }
 0x14d   :  { %v913_v16 = vpop.eup %912 }
 0x14e   :  { %v915_v18 = vpop.eup %914 }
 0x14f   :  { %742 = vperm.xlu1 %860, %v901_v30   ;;  %v917_v5 = vpop.eup %916  ;;  %v561_v19 = vsel %vm481_vm0, %v915_v18, 0.0 }
 0x150   :  { %v919_v45 = vpop.eup %918 }
 0x151   :  { %v689_v51 = vsel %vm481_vm0, %v919_v45, 0.0  ;;  %v921_v50 = vpop.eup %920 }
 0x153   :  { %745 = vperm.xlu1 %860, %v903_v2  }
 0x157   :  { %748 = vperm.xlu1 %860, %v905_v58  }
 0x15b   :  { %599 = vperm.xlu1 %860, %v907_v48  }
 0x15f   :  { %605 = vperm.xlu1 %860, %v909_v23  }
 0x163   :  { %608 = vperm.xlu1 %860, %v911_v7  }
 0x167   :  { %611 = vperm.xlu1 %860, %v913_v16  }
 0x169   :  { %562 = vadd.xlane.f32.xlu0 %v561_v19 }
 0x16b   :  { %614 = vperm.xlu1 %860, %v917_v5  }
 0x16d   :  { %690 = vadd.xlane.f32.xlu0 %v689_v51 }
 0x16f   :  { %754 = vperm.xlu1 %860, %v921_v50  }
 0x1bd   :  { %v603_v63 = vpop.permute.xlu0 %602 }
 0x1be   :  { %v631_v41 = vrot.slane %v603_v63, %v626_v37 }
 0x1c1   :  { %v618_v46 = vpop.permute.xlu0 %617 }
 0x1c2   :  { %v734_v52 = vpop.permute.xlu1 %733  ;;  %v651_v31 = vrot.slane %v618_v46, %v626_v37 }
 0x1c3   :  { %v759_v21 = vrot.slane %v734_v52, %v626_v37 }
 0x1c5   :  { %v621_v9 = vpop.permute.xlu0 %620 }
 0x1c6   :  { %v737_v54 = vpop.permute.xlu1 %736  ;;  %v655_v2 = vrot.slane %v621_v9, %v626_v37 }
 0x1c7   :  { %v763_v10 = vrot.slane %v737_v54, %v626_v37 }
 0x1c9   :  { %v788_v3 = vsel %vm656_vm2, %v763_v10, %v759_v21  ;;  %v752_v60 = vpop.permute.xlu0 %751 }
 0x1ca   :  { %v740_v62 = vpop.permute.xlu1 %739  ;;  %v783_v40 = vrot.slane %v752_v60, %v626_v37 }
 0x1cb   :  { %v767_v59 = vrot.slane %v740_v62, %v626_v37 }
 0x1cd   :  { %v789_v11 = vsel %vm658_vm3, %v767_v59, %v788_v3 }
 0x1ce   :  { %v743_v12 = vpop.permute.xlu1 %742 }
 0x1cf   :  { %v771_v0 = vrot.slane %v743_v12, %v626_v37 }
 0x1d1   :  { %v790_v36 = vsel %vm660_vm4, %v771_v0, %v789_v11 }
 0x1d2   :  { %v746_v35 = vpop.permute.xlu1 %745 }
 0x1d3   :  { %v775_v24 = vrot.slane %v746_v35, %v626_v37 }
 0x1d5   :  { %v791_v57 = vsel %vm662_vm5, %v775_v24, %v790_v36 }
 0x1d6   :  { %v749_v44 = vpop.permute.xlu1 %748 }
 0x1d7   :  { %v779_v55 = vrot.slane %v749_v44, %v626_v37 }
 0x1d9   :  { %v792_v22 = vsel %vm664_vm6, %v779_v55, %v791_v57 }
 0x1da   :  { %v600_v1 = vpop.permute.xlu1 %599  ;;  %v793_v42 = vsel %vm666_vm7, %v783_v40, %v792_v22 }
 0x1db   :  { %v627_v39 = vrot.slane %v600_v1, %v626_v37 }
 0x1dd   :  { %v657_v26 = vsel %vm656_vm2, %v631_v41, %v627_v39 }
 0x1de   :  { %v606_v4 = vpop.permute.xlu1 %605 }
 0x1df   :  { %v635_v17 = vrot.slane %v606_v4, %v626_v37 }
 0x1e1   :  { %v659_v27 = vsel %vm658_vm3, %v635_v17, %v657_v26  ;;  %v572_v17 = vstv %s833_s20 }
 0x1e2   :  { %v609_v8 = vpop.permute.xlu1 %608 }
 0x1e3   :  { %v639_v43 = vrot.slane %v609_v8, %v626_v37 }
 0x1e5   :  { %v661_v56 = vsel %vm660_vm4, %v639_v43, %v659_v27 }
 0x1e6   :  { %v612_v20 = vpop.permute.xlu1 %611 }
 0x1e7   :  { %v643_v25 = vrot.slane %v612_v20, %v626_v37  ;;  %v683_v20 = vstv %s1294_s14 }
 0x1e9   :  { %v663_v6 = vsel %vm662_vm5, %v643_v25, %v661_v56 }
 0x1ea   :  { %v615_v13 = vpop.permute.xlu1 %614 }
 0x1eb   :  { %v647_v30 = vrot.slane %v615_v13, %v626_v37 }
 0x1ed   :  { %v665_v15 = vsel %vm664_vm6, %v647_v30, %v663_v6 }
 0x1ee   :  { %v755_v38 = vpop.permute.xlu1 %754  ;;  %v667_v58 = vsel %vm666_vm7, %v651_v31, %v665_v15 }
 0x1ef   :  { %v787_v61 = vrot.slane %v755_v38, %v626_v37  ;;  %v669_v34 = vsel %vm668_vm8, %v655_v2, %v667_v58 }
 0x1f0   :  { %v672_v33 = vsel %vm671_vm9, %v669_v34, 0.0 }
 0x1f1   :  { %673 = vadd.xlane.f32.xlu1 %v672_v33  ;;  %v794_v48 = vsel %vm668_vm8, %v787_v61, %v793_v42 }
 0x1f2   :  { %v796_v29 = vsel %vm671_vm9, %v794_v48, 0.0 }
 0x1f3   :  { %797 = vadd.xlane.f32.xlu0 %v796_v29 }
 0x1f6   :  { %v563_v32 = vpop.xlane.xlu0 %562 }
 0x1f7   :  { %v564_v28 = vrot.slane %v563_v32, 4 }
 0x1f9   :  { %v565_v23 = vadd.f32 %v564_v28, %v563_v32 }
 0x1fa   :  { %v691_v5 = vpop.xlane.xlu0 %690 }
 0x1fb   :  { %v566_v14 = vrot.slane %v565_v23, 2  ;;  %v692_v19 = vrot.slane %v691_v5, 4 }
 0x1fd   :  { %v567_v7 = vadd.f32 %v566_v14, %v565_v23  ;;  %v693_v45 = vadd.f32 %v692_v19, %v691_v5 }
 0x1ff   :  { %v568_v16 = vrot.slane %v567_v7, 1  ;;  %v694_v51 = vrot.slane %v693_v45, 2 }
 0x201   :  { %v569_v18 = vadd.f32 %v568_v16, %v567_v7  ;;  %v695_v35 = vadd.f32 %v694_v51, %v693_v45 }
 0x203   :  { %843 = vpush %v569_v18  ;;  %v696_v49 = vrot.slane %v695_v35, 1 }
 0x205   :  { %v697_v10 = vadd.f32 %v696_v49, %v695_v35 }
 0x234   :  { %s844_s21 = spop %843 }
 0x235   :  { %v571_v59 = vstv %s844_s21 }
 0x236   :  { %v573_v21 = vmul.f32 %v572_v17, %v571_v59 }
 0x27e   :  { %v674_v50 = vpop.xlane.xlu1 %673 }
 0x27f   :  { %v675_v52 = vrot.slane %v674_v50, 4 }
 0x280   :  { %v798_v54 = vpop.xlane.xlu0 %797 }
 0x281   :  { %v676_v62 = vadd.f32 %v675_v52, %v674_v50  ;;  %v799_v12 = vrot.slane %v798_v54, 4 }
 0x283   :  { %v677_v44 = vrot.slane %v676_v62, 2  ;;  %v800_v63 = vadd.f32 %v799_v12, %v798_v54 }
 0x285   :  { %v678_v1 = vadd.f32 %v677_v44, %v676_v62  ;;  %v801_v4 = vrot.slane %v800_v63, 2 }
 0x287   :  { %v802_v46 = vadd.f32 %v801_v4, %v800_v63  ;;  %v679_v8 = vrot.slane %v678_v1, 1 }
 0x289   :  { %v680_v37 = vadd.f32 %v679_v8, %v678_v1  ;;  %v803_v9 = vrot.slane %v802_v46, 1 }
 0x28b   :  { %845 = vpush %v680_v37  ;;  %v804_v39 = vadd.f32 %v803_v9, %v802_v46 }
 0x28c   :  { %847 = vpush %v697_v10 }
 0x28d   :  { %849 = vpush %v804_v39 }
 0x2bc   :  { %s846_s22 = spop %845 }
 0x2bd   :  { %v682_v41 = vstv %s846_s22  ;;  %s848_s23 = spop %847 }
 0x2be   :  { %v684_v0 = vmul.f32 %v683_v20, %v682_v41  ;;  %s850_s24 = spop %849  ;;  %v699_v43 = vstv %s848_s23 }
 0x2bf   :  { %v806_v24 = vstv %s850_s24 }
 0x2c0   :  { %v685_v25 = vadd.f32 %v684_v0, %v573_v21  ;;  %v807_v3 = vadd.f32 %v806_v24, %v699_v43 }
 0x2c2   :  { %922 = vlog2.f32 %v685_v25 }
 0x2c3   :  { %924 = vlog2.f32 %v807_v3 }
 0x2cc   :  { %v923_v55 = vpop.eup %922 }
 0x2cd   :  { %v925_v26 = vpop.eup %924  ;;  %v812_v11 = vmul.f32 0.6931472, %v923_v55 }
 0x2ce   :  { %v809_v27 = vmul.f32 0.6931472, %v925_v26 }
 0x2cf   :  { %v813_v13 = vadd.f32 %v812_v11, %v1303_v47 }
 0x2d0   :  { %v810_v60 = vadd.f32 %v809_v27, %v1315_v53 }
 0x2d2   :  { %v814_v36 = vsub.f32 %v810_v60, %v813_v13 }
 0x2d4   :  { %851 = vpush %v814_v36 }
 0x305   :  { %s852_s25 = spop %851 }
 0x306   :  { %817 = sst [smem:[#allocation7]] %s852_s25 }
 0x307   :  { %969 = shalt.err (!%p966_p2)
}
 0x308   :  { %s982_s7 = smov [#allocation7]  }
 0x309   :  { %825 = dma.smem_to_hbm %s982_s7, 16, %s1385_s5, [#allocation4]  }
 0x30a   :  { %974 = dma.done.wait [#allocation4], 16  }
 0x30b   :  { %975 = vsyncadd [#allocation4], 4294967280 }
 0x30c   :  { %829 = sfence }
 0x30d   :  { %830 = vsyncpa [#allocation3], 1 }
 0x30e   :  { %831 = vsyncpa [#allocation4], 1 }
 0x30f   :  { %832 = vsyncpa [#allocation5], 1 }

</bundles_post_ra>
